<compile_context>
chip_gen: v7x
topology: tpu7x:2x2x1
jax: 0.10.0
libtpu: 0.0.40
codegen_flags: <defaults>
</compile_context>

<pallas_src>
import jax
import jax.numpy as jnp
from jax import lax
from jax.experimental import pallas as pl
from jax.experimental.pallas import tpu as pltpu


def joint_kernel(rid_ref, h_ref, tp_ref, tn_ref, rel_ref,
                 w1_ref, b1_ref, w2_ref, b2_ref,
                 pos_ref, neg_ref):
    """Fused projection MLP + relation lookup + TransE L2 scoring, one batch tile.

    rid      : (TB, 1) int32 relation ids
    h/tp/tn  : (TB, S) f32 SBERT embeddings (banner / positive / negative)
    rel      : (R, E)  f32 relation-embedding table (VMEM-resident)
    w1:(S,H) bf16  b1:(1,H) f32  w2:(H,E) bf16  b2:(1,E) f32
    pos/neg  : (1, TB) f32 — ||h + r - t||_2 with batch on the lane axis
    """
    w1 = w1_ref[...]
    b1 = b1_ref[...]
    w2 = w2_ref[...]
    b2 = b2_ref[...]

    def project(x_ref):
        # projection_layer: Linear -> ReLU -> Dropout -> Linear
        # f32 HBM read, bf16 cast happens here in VMEM (MXU-native operands),
        # f32 accumulation; ReLU / bias adds stay f32.
        # TODO(synk): nn.Dropout(0.5) is stochastic training-time only; identity (eval) here.
        x = x_ref[...].astype(jnp.bfloat16)                       # (TB, S)
        pre = jnp.dot(x, w1, preferred_element_type=jnp.float32) + b1
        act = jnp.maximum(pre, 0.0)
        return jnp.dot(act.astype(jnp.bfloat16), w2,
                       preferred_element_type=jnp.float32) + b2   # (TB, E) f32

    h = project(h_ref)
    t_pos = project(tp_ref)
    t_neg = project(tn_ref)

    # nn.Embedding lookup as an exact one-hot matmul on the (otherwise idle) MXU:
    # 0/1 f32 one-hot x f32 table picks exactly one row — bit-exact gather.
    tb = rid_ref.shape[0]
    num_rel = rel_ref.shape[0]
    rid = rid_ref[...]                                             # (TB, 1) int32
    iota = lax.broadcasted_iota(jnp.int32, (tb, num_rel), 1)
    onehot = (iota == rid).astype(jnp.float32)                     # (TB, R)
    r = jnp.dot(onehot, rel_ref[...],
                preferred_element_type=jnp.float32)                # (TB, E) f32

    hr = h + r                     # hoisted, shared by both scores
    d_pos = hr - t_pos
    d_neg = hr - t_neg

    def l2_lane_major(d):
        # Transpose so the batch dim sits on the 128-lane axis; the sublane
        # reduce then yields a lane-dense (1, TB) row -> unmasked vst.
        # (DMA-bound today; if the XLU ever shows up, switch to an MXU
        #  ones-vector reduce per the perf notes.)
        dt = d.T                                                   # (E, TB)
        return jnp.sqrt(jnp.sum(dt * dt, axis=0, keepdims=True))   # (1, TB)

    pos_ref[...] = l2_lane_major(d_pos)
    neg_ref[...] = l2_lane_major(d_neg)


def _round_up(x, m):
    return ((x + m - 1) // m) * m


def joint_model_forward(h_sbert, tpos_sbert, tneg_sbert, relation_id,
                        rel_emb, w1, b1, w2, b2, *, tile_b=512):
    """Tiled pallas_call. Returns (pos_score, neg_score), each (B,) f32.

    No activation pad / no wrapper-side activation cast: f32 SBERT embeddings go
    straight to the kernel; ragged last blocks are handled by Pallas and the
    outputs are sliced back to [:B].
    """
    B, S = h_sbert.shape
    H = w1.shape[1]
    E = w2.shape[1]
    R = rel_emb.shape[0]

    # Clamp the tile: never much larger than the batch, multiple of 8 sublanes,
    # and (when B allows) at least two tiles so the "parallel" grid axis can
    # shard across v7x's two TensorCores.  Default 512 amortizes the ~0.35 us
    # per-grid-step pipeline overhead on v5e/v6e/v7x.
    tile_b = max(8, min(tile_b, _round_up(pl.cdiv(B, 2), 8)))
    tile_b = _round_up(tile_b, 8)
    n_tiles = pl.cdiv(B, tile_b)

    # Parameters are tiny: cast once in the wrapper.  Activations are NOT cast here.
    w1_bf = w1.astype(jnp.bfloat16)
    w2_bf = w2.astype(jnp.bfloat16)
    b1_f = b1.astype(jnp.float32).reshape(1, H)
    b2_f = b2.astype(jnp.float32).reshape(1, E)
    rel_f = rel_emb.astype(jnp.float32)
    rid = relation_id.astype(jnp.int32).reshape(B, 1)

    def batch_spec(width):
        return pl.BlockSpec((tile_b, width), lambda i: (i, 0))

    def const_spec(shape):
        # Constant index_map + single buffer: DMA'd once, stays VMEM-resident,
        # no pointless double-buffer copy.
        return pl.BlockSpec(shape, lambda i: (0, 0), pipeline_mode=pl.Buffered(1))

    grid_spec = pltpu.PrefetchScalarGridSpec(
        num_scalar_prefetch=0,
        grid=(n_tiles,),
        in_specs=[
            batch_spec(1),                                  # relation ids
            batch_spec(S), batch_spec(S), batch_spec(S),    # h / t_pos / t_neg tiles
            const_spec((R, E)),                             # relation-embedding table
            const_spec((S, H)), const_spec((1, H)),         # w1, b1
            const_spec((H, E)), const_spec((1, E)),         # w2, b2
        ],
        out_specs=(
            pl.BlockSpec((1, tile_b), lambda i: (i, 0)),    # pos scores, lane-dense
            pl.BlockSpec((1, tile_b), lambda i: (i, 0)),    # neg scores, lane-dense
        ),
    )

    pos, neg = pl.pallas_call(
        joint_kernel,
        out_shape=(jax.ShapeDtypeStruct((n_tiles, tile_b), jnp.float32),
                   jax.ShapeDtypeStruct((n_tiles, tile_b), jnp.float32)),
        grid_spec=grid_spec,
        compiler_params=pltpu.CompilerParams(
            dimension_semantics=("parallel",),              # megacore sharding on v7x
            vmem_limit_bytes=48 * 1024 * 1024),             # headroom under v7x 64 MiB
    )(rid, h_sbert, tpos_sbert, tneg_sbert, rel_f, w1_bf, b1_f, w2_bf, b2_f)

    # Keep this slice: padded / ragged lanes must never reach a later reduction.
    return pos.reshape(-1)[:B], neg.reshape(-1)[:B]


def xavier_uniform(key, fan_in, fan_out, shape):
    bound = jnp.sqrt(6.0 / (fan_in + fan_out))
    return jax.random.uniform(key, shape, jnp.float32, -bound, bound)


if __name__ == "__main__":
    # Small, lane-aligned shapes consistent with the module's config.
    B = 8                 # batch size
    SBERT_DIM = 128       # sbert_embedding_dim
    HIDDEN_DIM = 128      # hidden_dim
    ENTITY_DIM = 128      # entity_embedding_dim
    NUM_RELATIONS = 16

    key = jax.random.PRNGKey(0)
    k = jax.random.split(key, 8)

    # Deterministic stand-ins for SBERT outputs (banner / positive / negative texts).
    h_sbert = jax.random.normal(k[0], (B, SBERT_DIM), jnp.float32)
    tpos_sbert = jax.random.normal(k[1], (B, SBERT_DIM), jnp.float32)
    tneg_sbert = jax.random.normal(k[2], (B, SBERT_DIM), jnp.float32)
    relation_id = jax.random.randint(k[3], (B,), 0, NUM_RELATIONS)

    # Parameters (xavier_uniform weights, zero biases), matching _init_weights.
    # Stored as (in, out) — transpose of PyTorch's (out, in) Linear weight.
    w1 = xavier_uniform(k[4], SBERT_DIM, HIDDEN_DIM, (SBERT_DIM, HIDDEN_DIM))
    b1 = jnp.zeros((HIDDEN_DIM,), jnp.float32)
    w2 = xavier_uniform(k[5], HIDDEN_DIM, ENTITY_DIM, (HIDDEN_DIM, ENTITY_DIM))
    b2 = jnp.zeros((ENTITY_DIM,), jnp.float32)
    rel_emb = xavier_uniform(k[6], NUM_RELATIONS, ENTITY_DIM,
                             (NUM_RELATIONS, ENTITY_DIM))

    pos_score, neg_score = joint_model_forward(
        h_sbert, tpos_sbert, tneg_sbert, relation_id, rel_emb,
        w1, b1, w2, b2, tile_b=512)
    jax.block_until_ready((pos_score, neg_score))

    # Pure-JAX reference with the same bf16-operand / f32-accumulate matmul numerics.
    def proj_ref(x):
        pre = jnp.dot(x.astype(jnp.bfloat16), w1.astype(jnp.bfloat16),
                      preferred_element_type=jnp.float32) + b1
        act = jnp.maximum(pre, 0.0)
        return jnp.dot(act.astype(jnp.bfloat16), w2.astype(jnp.bfloat16),
                       preferred_element_type=jnp.float32) + b2

    h_r, tp_r, tn_r = proj_ref(h_sbert), proj_ref(tpos_sbert), proj_ref(tneg_sbert)
    r_r = rel_emb[relation_id]
    pos_ref_v = jnp.linalg.norm(h_r + r_r - tp_r, axis=1)
    neg_ref_v = jnp.linalg.norm(h_r + r_r - tn_r, axis=1)
    assert jnp.allclose(pos_score, pos_ref_v, rtol=1e-2, atol=1e-2), (pos_score, pos_ref_v)
    assert jnp.allclose(neg_score, neg_ref_v, rtol=1e-2, atol=1e-2), (neg_score, neg_ref_v)

    print("KERNEL_OK")
</pallas_src>

<mosaic_0001>
module attributes {stable_mosaic.version = 11 : i64} {
  func.func @joint_kernel(%arg0: i32, %arg1: memref<8x1xi32, #tpu.memory_space<vmem>>, %arg2: memref<8x128xf32, #tpu.memory_space<vmem>>, %arg3: memref<8x128xf32, #tpu.memory_space<vmem>>, %arg4: memref<8x128xf32, #tpu.memory_space<vmem>>, %arg5: memref<16x128xf32, #tpu.memory_space<vmem>>, %arg6: memref<128x128xbf16, #tpu.memory_space<vmem>>, %arg7: memref<1x128xf32, #tpu.memory_space<vmem>>, %arg8: memref<128x128xbf16, #tpu.memory_space<vmem>>, %arg9: memref<1x128xf32, #tpu.memory_space<vmem>>, %arg10: memref<1x8xf32, #tpu.memory_space<vmem>>, %arg11: memref<1x8xf32, #tpu.memory_space<vmem>>) attributes {dimension_semantics = [#tpu.dimension_semantics<parallel>], iteration_bounds = array<i64: 1>, scalar_prefetch = 0 : i64, scratch_operands = 0 : i64, tpu.core_type = #tpu.core_type<tc>, window_params = [{transform_indices = @transform_0, window_bounds = array<i64: 8, 1>}, {transform_indices = @transform_1, window_bounds = array<i64: 8, 128>}, {transform_indices = @transform_2, window_bounds = array<i64: 8, 128>}, {transform_indices = @transform_3, window_bounds = array<i64: 8, 128>}, {pipeline_mode = #tpu.pipeline_mode<synchronous>, transform_indices = @transform_4, window_bounds = array<i64: 16, 128>}, {pipeline_mode = #tpu.pipeline_mode<synchronous>, transform_indices = @transform_5, window_bounds = array<i64: 128, 128>}, {pipeline_mode = #tpu.pipeline_mode<synchronous>, transform_indices = @transform_6, window_bounds = array<i64: 1, 128>}, {pipeline_mode = #tpu.pipeline_mode<synchronous>, transform_indices = @transform_7, window_bounds = array<i64: 128, 128>}, {pipeline_mode = #tpu.pipeline_mode<synchronous>, transform_indices = @transform_8, window_bounds = array<i64: 1, 128>}, {transform_indices = @transform_9, window_bounds = array<i64: 1, 8>}, {transform_indices = @transform_10, window_bounds = array<i64: 1, 8>}]} {
    %c0 = arith.constant 0 : index
    %c0_0 = arith.constant 0 : index
    %0 = vector.load %arg6[%c0, %c0_0] : memref<128x128xbf16, #tpu.memory_space<vmem>>, vector<128x128xbf16>
    %c0_1 = arith.constant 0 : index
    %c0_2 = arith.constant 0 : index
    %1 = vector.load %arg7[%c0_1, %c0_2] : memref<1x128xf32, #tpu.memory_space<vmem>>, vector<1x128xf32>
    %c0_3 = arith.constant 0 : index
    %c0_4 = arith.constant 0 : index
    %2 = vector.load %arg8[%c0_3, %c0_4] : memref<128x128xbf16, #tpu.memory_space<vmem>>, vector<128x128xbf16>
    %c0_5 = arith.constant 0 : index
    %c0_6 = arith.constant 0 : index
    %3 = vector.load %arg9[%c0_5, %c0_6] : memref<1x128xf32, #tpu.memory_space<vmem>>, vector<1x128xf32>
    %c0_7 = arith.constant 0 : index
    %c0_8 = arith.constant 0 : index
    %4 = vector.load %arg2[%c0_7, %c0_8] : memref<8x128xf32, #tpu.memory_space<vmem>>, vector<8x128xf32>
    %5 = arith.truncf %4 : vector<8x128xf32> to vector<8x128xbf16>
    %cst = arith.constant dense<0.000000e+00> : vector<8x128xf32>
    %6 = tpu.matmul %5, %0, %cst {dimension_numbers = #tpu.dot_dimension_numbers<[1], [0], [0], [1], [0, 0, 1, 1], [], []>} : vector<8x128xbf16>, vector<128x128xbf16>, vector<8x128xf32> -> vector<8x128xf32>
    %7 = vector.broadcast %1 : vector<1x128xf32> to vector<8x128xf32>
    %8 = arith.addf %6, %7 : vector<8x128xf32>
    %cst_9 = arith.constant 0.000000e+00 : f32
    %9 = vector.broadcast %cst_9 : f32 to vector<8x128xf32>
    %10 = arith.maximumf %8, %9 : vector<8x128xf32>
    %11 = arith.truncf %10 : vector<8x128xf32> to vector<8x128xbf16>
    %cst_10 = arith.constant dense<0.000000e+00> : vector<8x128xf32>
    %12 = tpu.matmul %11, %2, %cst_10 {dimension_numbers = #tpu.dot_dimension_numbers<[1], [0], [0], [1], [0, 0, 1, 1], [], []>} : vector<8x128xbf16>, vector<128x128xbf16>, vector<8x128xf32> -> vector<8x128xf32>
    %13 = vector.broadcast %3 : vector<1x128xf32> to vector<8x128xf32>
    %14 = arith.addf %12, %13 : vector<8x128xf32>
    %c0_11 = arith.constant 0 : index
    %c0_12 = arith.constant 0 : index
    %15 = vector.load %arg3[%c0_11, %c0_12] : memref<8x128xf32, #tpu.memory_space<vmem>>, vector<8x128xf32>
    %16 = arith.truncf %15 : vector<8x128xf32> to vector<8x128xbf16>
    %cst_13 = arith.constant dense<0.000000e+00> : vector<8x128xf32>
    %17 = tpu.matmul %16, %0, %cst_13 {dimension_numbers = #tpu.dot_dimension_numbers<[1], [0], [0], [1], [0, 0, 1, 1], [], []>} : vector<8x128xbf16>, vector<128x128xbf16>, vector<8x128xf32> -> vector<8x128xf32>
    %18 = vector.broadcast %1 : vector<1x128xf32> to vector<8x128xf32>
    %19 = arith.addf %17, %18 : vector<8x128xf32>
    %cst_14 = arith.constant 0.000000e+00 : f32
    %20 = vector.broadcast %cst_14 : f32 to vector<8x128xf32>
    %21 = arith.maximumf %19, %20 : vector<8x128xf32>
    %22 = arith.truncf %21 : vector<8x128xf32> to vector<8x128xbf16>
    %cst_15 = arith.constant dense<0.000000e+00> : vector<8x128xf32>
    %23 = tpu.matmul %22, %2, %cst_15 {dimension_numbers = #tpu.dot_dimension_numbers<[1], [0], [0], [1], [0, 0, 1, 1], [], []>} : vector<8x128xbf16>, vector<128x128xbf16>, vector<8x128xf32> -> vector<8x128xf32>
    %24 = vector.broadcast %3 : vector<1x128xf32> to vector<8x128xf32>
    %25 = arith.addf %23, %24 : vector<8x128xf32>
    %c0_16 = arith.constant 0 : index
    %c0_17 = arith.constant 0 : index
    %26 = vector.load %arg4[%c0_16, %c0_17] : memref<8x128xf32, #tpu.memory_space<vmem>>, vector<8x128xf32>
    %27 = arith.truncf %26 : vector<8x128xf32> to vector<8x128xbf16>
    %cst_18 = arith.constant dense<0.000000e+00> : vector<8x128xf32>
    %28 = tpu.matmul %27, %0, %cst_18 {dimension_numbers = #tpu.dot_dimension_numbers<[1], [0], [0], [1], [0, 0, 1, 1], [], []>} : vector<8x128xbf16>, vector<128x128xbf16>, vector<8x128xf32> -> vector<8x128xf32>
    %29 = vector.broadcast %1 : vector<1x128xf32> to vector<8x128xf32>
    %30 = arith.addf %28, %29 : vector<8x128xf32>
    %cst_19 = arith.constant 0.000000e+00 : f32
    %31 = vector.broadcast %cst_19 : f32 to vector<8x128xf32>
    %32 = arith.maximumf %30, %31 : vector<8x128xf32>
    %33 = arith.truncf %32 : vector<8x128xf32> to vector<8x128xbf16>
    %cst_20 = arith.constant dense<0.000000e+00> : vector<8x128xf32>
    %34 = tpu.matmul %33, %2, %cst_20 {dimension_numbers = #tpu.dot_dimension_numbers<[1], [0], [0], [1], [0, 0, 1, 1], [], []>} : vector<8x128xbf16>, vector<128x128xbf16>, vector<8x128xf32> -> vector<8x128xf32>
    %35 = vector.broadcast %3 : vector<1x128xf32> to vector<8x128xf32>
    %36 = arith.addf %34, %35 : vector<8x128xf32>
    %c0_21 = arith.constant 0 : index
    %c0_22 = arith.constant 0 : index
    %37 = vector.load %arg1[%c0_21, %c0_22] : memref<8x1xi32, #tpu.memory_space<vmem>>, vector<8x1xi32>
    %38 = tpu.iota {dimensions = array<i32: 1>} : vector<8x16xi32>
    %39 = vector.broadcast %37 : vector<8x1xi32> to vector<8x16xi32>
    %40 = arith.cmpi eq, %38, %39 : vector<8x16xi32>
    %41 = arith.extui %40 : vector<8x16xi1> to vector<8x16xi32>
    %42 = arith.sitofp %41 : vector<8x16xi32> to vector<8x16xf32>
    %c0_23 = arith.constant 0 : index
    %c0_24 = arith.constant 0 : index
    %43 = vector.load %arg5[%c0_23, %c0_24] : memref<16x128xf32, #tpu.memory_space<vmem>>, vector<16x128xf32>
    %cst_25 = arith.constant dense<0.000000e+00> : vector<8x128xf32>
    %44 = tpu.matmul %42, %43, %cst_25 {dimension_numbers = #tpu.dot_dimension_numbers<[1], [0], [0], [1], [0, 0, 1, 1], [], []>} : vector<8x16xf32>, vector<16x128xf32>, vector<8x128xf32> -> vector<8x128xf32>
    %45 = arith.addf %14, %44 : vector<8x128xf32>
    %46 = arith.subf %45, %25 : vector<8x128xf32>
    %47 = arith.subf %45, %36 : vector<8x128xf32>
    %48 = tpu.transpose %46, [1, 0] : vector<8x128xf32> -> vector<128x8xf32>
    %49 = arith.mulf %48, %48 : vector<128x8xf32>
    %cst_26 = arith.constant dense<0.000000e+00> : vector<8xf32>
    %50 = vector.multi_reduction <add>, %49, %cst_26 [0] : vector<128x8xf32> to vector<8xf32>
    %51 = vector.shape_cast %50 : vector<8xf32> to vector<1x8xf32>
    %52 = math.sqrt %51 : vector<1x8xf32>
    %c0_27 = arith.constant 0 : index
    %c0_28 = arith.constant 0 : index
    %53 = vector.load %arg10[%c0_27, %c0_28] : memref<1x8xf32, #tpu.memory_space<vmem>>, vector<1x8xf32>
    tpu.vector_store %arg10[%c0_27, %c0_28], %52 {strides = array<i32>} : memref<1x8xf32, #tpu.memory_space<vmem>>, vector<1x8xf32>,
    %54 = tpu.transpose %47, [1, 0] : vector<8x128xf32> -> vector<128x8xf32>
    %55 = arith.mulf %54, %54 : vector<128x8xf32>
    %cst_29 = arith.constant dense<0.000000e+00> : vector<8xf32>
    %56 = vector.multi_reduction <add>, %55, %cst_29 [0] : vector<128x8xf32> to vector<8xf32>
    %57 = vector.shape_cast %56 : vector<8xf32> to vector<1x8xf32>
    %58 = math.sqrt %57 : vector<1x8xf32>
    %c0_30 = arith.constant 0 : index
    %c0_31 = arith.constant 0 : index
    %59 = vector.load %arg11[%c0_30, %c0_31] : memref<1x8xf32, #tpu.memory_space<vmem>>, vector<1x8xf32>
    tpu.vector_store %arg11[%c0_30, %c0_31], %58 {strides = array<i32>} : memref<1x8xf32, #tpu.memory_space<vmem>>, vector<1x8xf32>,
    return
  }
  func.func @transform_0(%arg0: i32) -> (i32, i32) {
    %c0_i32 = arith.constant 0 : i32
    %c0_i32_0 = arith.constant 0 : i32
    return %arg0, %c0_i32 : i32, i32
  }
  func.func @transform_1(%arg0: i32) -> (i32, i32) {
    %c0_i32 = arith.constant 0 : i32
    %c0_i32_0 = arith.constant 0 : i32
    return %arg0, %c0_i32 : i32, i32
  }
  func.func @transform_2(%arg0: i32) -> (i32, i32) {
    %c0_i32 = arith.constant 0 : i32
    %c0_i32_0 = arith.constant 0 : i32
    return %arg0, %c0_i32 : i32, i32
  }
  func.func @transform_3(%arg0: i32) -> (i32, i32) {
    %c0_i32 = arith.constant 0 : i32
    %c0_i32_0 = arith.constant 0 : i32
    return %arg0, %c0_i32 : i32, i32
  }
  func.func @transform_4(%arg0: i32) -> (i32, i32) {
    %c0_i32 = arith.constant 0 : i32
    %c0_i32_0 = arith.constant 0 : i32
    %c0_i32_1 = arith.constant 0 : i32
    return %c0_i32, %c0_i32_0 : i32, i32
  }
  func.func @transform_5(%arg0: i32) -> (i32, i32) {
    %c0_i32 = arith.constant 0 : i32
    %c0_i32_0 = arith.constant 0 : i32
    %c0_i32_1 = arith.constant 0 : i32
    return %c0_i32, %c0_i32_0 : i32, i32
  }
  func.func @transform_6(%arg0: i32) -> (i32, i32) {
    %c0_i32 = arith.constant 0 : i32
    %c0_i32_0 = arith.constant 0 : i32
    %c0_i32_1 = arith.constant 0 : i32
    return %c0_i32, %c0_i32_0 : i32, i32
  }
  func.func @transform_7(%arg0: i32) -> (i32, i32) {
    %c0_i32 = arith.constant 0 : i32
    %c0_i32_0 = arith.constant 0 : i32
    %c0_i32_1 = arith.constant 0 : i32
    return %c0_i32, %c0_i32_0 : i32, i32
  }
  func.func @transform_8(%arg0: i32) -> (i32, i32) {
    %c0_i32 = arith.constant 0 : i32
    %c0_i32_0 = arith.constant 0 : i32
    %c0_i32_1 = arith.constant 0 : i32
    return %c0_i32, %c0_i32_0 : i32, i32
  }
  func.func @transform_9(%arg0: i32) -> (i32, i32) {
    %c0_i32 = arith.constant 0 : i32
    %c0_i32_0 = arith.constant 0 : i32
    return %arg0, %c0_i32 : i32, i32
  }
  func.func @transform_10(%arg0: i32) -> (i32, i32) {
    %c0_i32 = arith.constant 0 : i32
    %c0_i32_0 = arith.constant 0 : i32
    return %arg0, %c0_i32 : i32, i32
  }
}

</mosaic_0001>

<bundles_post_ra>
// kernel: tpu_custom_call.1
= control target key start
LH: loop header
LB: loop body
LE: loop exit
PB: predicated region body
PF: predicated region fallthrough
CT: control target
= control target key end

     0   :  { %16 = vsyncpa [#allocation3], 0  ;;  %s1485_s0 = inlined_call_operand.vmem [shape: s32[8,1], index: 0, kind: input, shape index: {}]   ;;  %s1486_s1 = inlined_call_operand.vmem [shape: f32[8,128], index: 1, kind: input, shape index: {}]   ;;  %s1487_s2 = inlined_call_operand.hbm [shape: f32[8,128], index: 2, kind: input, shape index: {}]   ;;  %s1488_s3 = inlined_call_operand.hbm [shape: f32[8,128], index: 3, kind: input, shape index: {}]   ;;  %s1489_s4 = inlined_call_operand.vmem [shape: f32[16,128], index: 4, kind: input, shape index: {}]   ;;  %s1490_s5 = inlined_call_operand.hbm [shape: bf16[128,128], index: 5, kind: input, shape index: {}]   ;;  %s1491_s6 = inlined_call_operand.vmem [shape: f32[1,128], index: 6, kind: input, shape index: {}]   ;;  %s1492_s7 = inlined_call_operand.hbm [shape: bf16[128,128], index: 7, kind: input, shape index: {}]   ;;  %s1493_s8 = inlined_call_operand.vmem [shape: f32[1,128], index: 8, kind: input, shape index: {}]   ;;  %s1494_s9 = inlined_call_operand.hbm [shape: f32[1,8], index: 9, kind: output, shape index: {0}]   ;;  %s1495_s10 = inlined_call_operand.hbm [shape: f32[1,8], index: 10, kind: output, shape index: {1}]  }
   0x1   :  { %17 = vsyncpa [#allocation6], 0 }
   0x2   :  { %18 = vsyncpa [#allocation9], 0 }
   0x3   :  { %19 = vsyncpa [#allocation4], 0 }
   0x4   :  { %20 = vsyncpa [#allocation12], 0  ;;  %s1171_s13 = smov [#allocation5]   ;;  %s1172_s15 = smov [#allocation2]  }
   0x5   :  { %s41_s14 = sshll.u32 %s1171_s13, 4  ;;  %s31_s16 = sshll.u32 %s1172_s15, 4  ;;  %s42_s14 = int_to_ptr.vmem [resolvable:$true] %s41_s14  ;;  %s32_s16 = int_to_ptr.vmem [resolvable:$true] %s31_s16 }
   0x6   :  { %s1029_s19 = scalar_lea.hbm %s1488_s3, 128 }
   0x7   :  { %p1030_p0 = scmp.ne.s32.totalorder %s1488_s3, %s1029_s19  ;;  %p1033_p1 = scmp.lt.u32.totalorder %s1029_s19, %s1488_s3 }
   0x9   :  { %p1035_p2 = pnand %p1033_p1, %p1030_p0 }
   0xb   :  { %1038 = shalt.err (!%p1035_p2)
}
   0xc   :  { %s1039_s24 = scalar_lea.vmem %s42_s14, 128  ;;  %p1044_p4 = scmp.lt.s32.totalorder %s42_s14, %s42_s14 }
   0xd   :  { %p1040_p3 = scmp.ne.s32.totalorder %s42_s14, %s1039_s24  ;;  %p1045_p5 = scmp.lt.s32.totalorder %s1039_s24, %s1039_s24 }
   0xf   :  { %p1046_p6 = por %p1045_p5, %p1044_p4 }
  0x11   :  { %p1047_p7 = pnand %p1046_p6, %p1040_p3 }
  0x13   :  { %1050 = shalt.err (!%p1047_p7)
}
  0x14   :  { %44 = dma.hbm_to_vmem [thread:$0]  %s1488_s3, 128, %s42_s14, [#allocation6]  }
  0x15   :  { %s1051_s29 = scalar_lea.hbm %s1487_s2, 128 }
  0x16   :  { %p1052_p8 = scmp.ne.s32.totalorder %s1487_s2, %s1051_s29  ;;  %p1055_p9 = scmp.lt.u32.totalorder %s1051_s29, %s1487_s2 }
  0x18   :  { %p1057_p10 = pnand %p1055_p9, %p1052_p8 }
  0x1a   :  { %1060 = shalt.err (!%p1057_p10)
}
  0x1b   :  { %s1061_s15 = scalar_lea.vmem %s32_s16, 128  ;;  %p1066_p12 = scmp.lt.s32.totalorder %s32_s16, %s32_s16 }
  0x1c   :  { %p1062_p11 = scmp.ne.s32.totalorder %s32_s16, %s1061_s15  ;;  %p1067_p13 = scmp.lt.s32.totalorder %s1061_s15, %s1061_s15 }
  0x1e   :  { %p1068_p0 = por %p1067_p13, %p1066_p12 }
  0x20   :  { %p1069_p1 = pnand %p1068_p0, %p1062_p11 }
  0x22   :  { %1072 = shalt.err (!%p1069_p1)
}
  0x23   :  { %34 = dma.hbm_to_vmem [thread:$0]  %s1487_s2, 128, %s32_s16, [#allocation3]  }
  0x24   :  { %s1173_s17 = smov [#allocation7]   ;;  %s1073_s21 = scalar_lea.hbm %s1490_s5, 1024 }
  0x25   :  { %s52_s18 = sshll.u32 %s1173_s17, 4  ;;  %p1074_p2 = scmp.ne.s32.totalorder %s1490_s5, %s1073_s21  ;;  %s53_s18 = int_to_ptr.vmem [resolvable:$true] %s52_s18 }
  0x26   :  { %p1077_p3 = scmp.lt.u32.totalorder %s1073_s21, %s1490_s5 }
  0x28   :  { %p1079_p4 = pnand %p1077_p3, %p1074_p2 }
  0x2a   :  { %1082 = shalt.err (!%p1079_p4)
}
  0x2b   :  { %s1083_s26 = scalar_lea.vmem %s53_s18, 1024  ;;  %p1088_p6 = scmp.lt.s32.totalorder %s53_s18, %s53_s18 }
  0x2c   :  { %p1084_p5 = scmp.ne.s32.totalorder %s53_s18, %s1083_s26  ;;  %p1089_p7 = scmp.lt.s32.totalorder %s1083_s26, %s1083_s26 }
  0x2e   :  { %p1090_p8 = por %p1089_p7, %p1088_p6 }
  0x30   :  { %p1091_p9 = pnand %p1090_p8, %p1084_p5 }
  0x32   :  { %1094 = shalt.err (!%p1091_p9)
}
  0x33   :  { %s1174_s2 = smov 64   ;;  %s1175_s16 = smov 4  }
  0x34   :  { %58 = dma.hbm_to_vmem [thread:$0]  %s1490_s5, 1024, %s53_s18, [#allocation6], %s1174_s2, %s1174_s2, %s1175_s16  }
  0x35   :  { %s1176_s29 = smov [#allocation8]   ;;  %s1095_s13 = scalar_lea.hbm %s1492_s7, 1024 }
  0x36   :  { %s66_s30 = sshll.u32 %s1176_s29, 4  ;;  %p1096_p10 = scmp.ne.s32.totalorder %s1492_s7, %s1095_s13  ;;  %s67_s30 = int_to_ptr.vmem [resolvable:$true] %s66_s30 }
  0x37   :  { %p1099_p11 = scmp.lt.u32.totalorder %s1095_s13, %s1492_s7 }
  0x39   :  { %p1101_p12 = pnand %p1099_p11, %p1096_p10 }
  0x3b   :  { %1104 = shalt.err (!%p1101_p12)
}
  0x3c   :  { %s1105_s19 = scalar_lea.vmem %s67_s30, 1024  ;;  %p1110_p0 = scmp.lt.s32.totalorder %s67_s30, %s67_s30 }
  0x3d   :  { %p1106_p13 = scmp.ne.s32.totalorder %s67_s30, %s1105_s19  ;;  %p1111_p1 = scmp.lt.s32.totalorder %s1105_s19, %s1105_s19 }
  0x3f   :  { %p1112_p2 = por %p1111_p1, %p1110_p0 }
  0x41   :  { %p1113_p3 = pnand %p1112_p2, %p1106_p13 }
  0x43   :  { %1116 = shalt.err (!%p1113_p3)
}
  0x44   :  { %72 = dma.hbm_to_vmem [thread:$0]  %s1492_s7, 1024, %s67_s30, [#allocation9], %s1174_s2, %s1174_s2, %s1175_s16  }
  0x45   :  { %1161 = dma.done.wait [#allocation3], 128  }
  0x46   :  { %1162 = vsyncadd [#allocation3], 4294967168 }
  0x47   :  { %1163 = dma.done.wait [#allocation6], 1152  }
  0x48   :  { %1164 = vsyncadd [#allocation6], 4294966144 }
  0x49   :  { %1165 = dma.done.wait [#allocation9], 1024  }
  0x4a   :  { %1166 = vsyncadd [#allocation9], 4294966272  ;;  %v1177_v0 = vmov 0.0   ;;  %vm1178_vm0 = vmmov 0   ;;  %v1179_v1 = vmov 0   ;;  %v1292_v2 = vld [vmem:[#allocation7] sm:$0xff]   ;;  %v483_v29 = vlaneseq }
  0x4b   :  { %866 = vmatprep.subr.bf16.mxu0 %v1177_v0  ;;  %882 = vmatprep.mubr.msk.bf16.mxu0 %vm1178_vm0, %v1177_v0  ;;  %v1295_v3 = vld [vmem:[#allocation7 + $0x8] sm:$0xff]   ;;  %v1299_v4 = vld [vmem:[#allocation7 + $0x10] sm:$0xff]   ;;  %v1302_v5 = vld [vmem:[#allocation7 + $0x18] sm:$0xff]   ;;  %v1180_v28 = vmov 0.0|0.0   ;;  %vm493_vm1 = vcmask 130048   ;;  %vm618_vm3 = vcmask 64512  }
  0x4c   :  { %1008 = vset.pattern.permute.xlu0 %v1179_v1  ;;  %886 = vmatprep.subr.bf16.mxu1 %v1177_v0  ;;  %v482_v6 = vld [vmem:[%s1485_s0] sm:$0xff]  ;;  %v1312_v8 = vld [vmem:[#allocation8 + $0x8] sm:$0xff]   ;;  %v1317_v10 = vld [vmem:[#allocation8 + $0x10] sm:$0xff]   ;;  %v484_v30 = vand.u32 127, %v483_v29  ;;  %vm663_vm5 = vcmask 57344  }
  0x4d   :  { %902 = vmatprep.mubr.msk.bf16.mxu1 %vm1178_vm0, %v1177_v0  ;;  %867 = vmatpush3.bf16.msra.mxu0 %v1292_v2  ;;  %v1308_v7 = vld [vmem:[#allocation8] sm:$0xff]   ;;  %v1014_v11 = vld [vmem:[#allocation7 + $0x28] sm:$0xff]   ;;  %v1323_v12 = vld [vmem:[#allocation8 + $0x18] sm:$0xff]  }
  0x4e   :  { %868 = vmatprep.subr.bf16.mxu0 %v1177_v0  ;;  %486 = vperm.xlu0 %1008, %v482_v6   ;;  %v1013_v9 = vld [vmem:[#allocation7 + $0x20] sm:$0xff]   ;;  %v1015_v13 = vld [vmem:[#allocation7 + $0x30] sm:$0xff]   ;;  %v1016_v15 = vld [vmem:[#allocation7 + $0x38] sm:$0xff]  }
  0x4f   :  { %887 = vmatpush3.bf16.msra.mxu1 %v1308_v7  ;;  %v1328_v14 = vld [vmem:[#allocation8 + $0x20] sm:$0xff]   ;;  %v1336_v17 = vld [vmem:[#allocation8 + $0x28] sm:$0xff]   ;;  %v314_v19 = vld [vmem:[#allocation2] sm:$0xff] }
  0x50   :  { %888 = vmatprep.subr.bf16.mxu1 %v1177_v0  ;;  %v122_v16 = vld [vmem:[%s1486_s1] sm:$0xff]  ;;  %v315_v20 = vpack.c.bf16 %v314_v19, %v314_v19  ;;  %v398_v21 = vld [vmem:[#allocation5] sm:$0xff]  ;;  %v1371_v23 = vld [vmem:[#allocation8 + $0x30] sm:$0xff]  }
  0x51   :  { %869 = vmatpush3.bf16.msra.mxu0 %v1295_v3  ;;  %v123_v18 = vpack.c.bf16 %v122_v16, %v122_v16  ;;  %v399_v22 = vpack.c.bf16 %v398_v21, %v398_v21  ;;  %v1375_v24 = vld [vmem:[#allocation8 + $0x38] sm:$0xff]   ;;  %v491_v25 = vld [vmem:[%s1489_s4] sm:$0xff]  ;;  %v492_v26 = vld [vmem:[%s1489_s4 + $0x8] sm:$0xff] }
  0x52   :  { %870 = vmatprep.subr.bf16.mxu0 %v1177_v0  ;;  %v994_v27 = vpack.c.bf16 %v492_v26, %v491_v25  ;;  %v789_v33 = vld [vmem:[%s1491_s6] ss:$0 sm:$0xff] }
  0x53   :  { %889 = vmatpush3.bf16.msra.mxu1 %v1312_v8  ;;  %v798_v57 = vld [vmem:[%s1493_s8] ss:$0 sm:$0xff]  ;;  %s1181_s8 = smov [#allocation10]  }
  0x54   :  { %890 = vmatprep.subr.bf16.mxu1 %v1177_v0  ;;  %s764_s2 = sshll.u32 %s1181_s8, 4  ;;  %s765_s2 = int_to_ptr.vmem [resolvable:$true] %s764_s2 }
  0x55   :  { %871 = vmatpush3.bf16.msra.mxu0 %v1299_v4  ;;  %s1117_s16 = scalar_lea.vmem %s765_s2, 16  ;;  %s1121_s27 = scalar_lea.vmem %s765_s2, 32 }
  0x56   :  { %872 = vmatprep.subr.bf16.mxu0 %v1177_v0  ;;  %p1118_p4 = scmp.ne.s32.totalorder %s765_s2, %s1117_s16  ;;  %p1122_p5 = scmp.lt.s32.totalorder %s765_s2, %s765_s2 }
  0x57   :  { %891 = vmatpush3.bf16.msra.mxu1 %v1317_v10  ;;  %p1123_p6 = scmp.lt.s32.totalorder %s1121_s27, %s1117_s16 }
  0x58   :  { %892 = vmatprep.subr.bf16.mxu1 %v1177_v0 }
  0x59   :  { %873 = vmatpush3.bf16.msra.mxu0 %v1302_v5  ;;  %p1124_p7 = por %p1123_p6, %p1122_p5 }
  0x5a   :  { %874 = vmatprep.subr.bf16.mxu0 %v1177_v0 }
  0x5b   :  { %893 = vmatpush3.bf16.msra.mxu1 %v1323_v12  ;;  %p1125_p8 = pnand %p1124_p7, %p1118_p4 }
  0x5c   :  { %894 = vmatprep.subr.bf16.mxu1 %v1177_v0 }
  0x5d   :  { %875 = vmatpush3.bf16.msra.mxu0 %v1013_v9 }
  0x5e   :  { %876 = vmatprep.subr.bf16.mxu0 %v1177_v0 }
  0x5f   :  { %895 = vmatpush3.bf16.msra.mxu1 %v1328_v14 }
  0x60   :  { %896 = vmatprep.subr.bf16.mxu1 %v1177_v0 }
  0x61   :  { %877 = vmatpush3.bf16.msra.mxu0 %v1014_v11 }
  0x62   :  { %878 = vmatprep.subr.bf16.mxu0 %v1177_v0 }
  0x63   :  { %897 = vmatpush3.bf16.msra.mxu1 %v1336_v17 }
  0x64   :  { %898 = vmatprep.subr.bf16.mxu1 %v1177_v0 }
  0x65   :  { %879 = vmatpush3.bf16.msra.mxu0 %v1015_v13 }
  0x66   :  { %880 = vmatprep.subr.bf16.mxu0 %v1177_v0 }
  0x67   :  { %899 = vmatpush3.bf16.msra.mxu1 %v1371_v23 }
  0x68   :  { %900 = vmatprep.subr.bf16.mxu1 %v1177_v0 }
  0x69   :  { %881 = vmatpush3.bf16.msra.mxu0 %v1016_v15 }
  0x6a   :  { %906 = vmatprep.subr.bf16.mxu0 %v1177_v0 }
  0x6b   :  { %901 = vmatpush3.bf16.msra.mxu1 %v1375_v24 }
  0x6c   :  { %883 = vmatmul.mubr.bf16.vlgmr.msra.gmra.mrb[0].mxu0 %v123_v18  ;;  %926 = vmatprep.subr.bf16.mxu1 %v1177_v0 }
  0x6d   :  { %907 = vmatpush3.bf16.msra.mxu0 %v1292_v2  ;;  %922 = vmatprep.mubr.msk.bf16.mxu0 %vm1178_vm0, %v1177_v0 }
  0x6e   :  { %908 = vmatprep.subr.bf16.mxu0 %v1177_v0 }
  0x71   :  { %909 = vmatpush3.bf16.msra.mxu0 %v1295_v3 }
  0x72   :  { %910 = vmatprep.subr.bf16.mxu0 %v1177_v0 }
  0x75   :  { %911 = vmatpush3.bf16.msra.mxu0 %v1299_v4 }
  0x76   :  { %912 = vmatprep.subr.bf16.mxu0 %v1177_v0 }
  0x79   :  { %913 = vmatpush3.bf16.msra.mxu0 %v1302_v5 }
  0x7a   :  { %914 = vmatprep.subr.bf16.mxu0 %v1177_v0 }
  0x7d   :  { %915 = vmatpush3.bf16.msra.mxu0 %v1013_v9 }
  0x7e   :  { %916 = vmatprep.subr.bf16.mxu0 %v1177_v0 }
  0x81   :  { %917 = vmatpush3.bf16.msra.mxu0 %v1014_v11 }
  0x82   :  { %918 = vmatprep.subr.bf16.mxu0 %v1177_v0 }
  0x85   :  { %919 = vmatpush3.bf16.msra.mxu0 %v1015_v13 }
  0x86   :  { %920 = vmatprep.subr.bf16.mxu0 %v1177_v0 }
  0x89   :  { %921 = vmatpush3.bf16.msra.mxu0 %v1016_v15 }
  0x8a   :  { %946 = vmatprep.subr.bf16.mxu0 %v1177_v0 }
  0x8c   :  { %923 = vmatmul.mubr.bf16.vlgmr.msra.gmra.mrb[4].mxu0 %v315_v20 }
  0x8d   :  { %947 = vmatpush3.bf16.msra.mxu0 %v1292_v2  ;;  %962 = vmatprep.mubr.msk.bf16.mxu0 %vm1178_vm0, %v1177_v0 }
  0x8e   :  { %948 = vmatprep.subr.bf16.mxu0 %v1177_v0 }
  0x91   :  { %949 = vmatpush3.bf16.msra.mxu0 %v1295_v3 }
  0x92   :  { %950 = vmatprep.subr.bf16.mxu0 %v1177_v0 }
  0x95   :  { %951 = vmatpush3.bf16.msra.mxu0 %v1299_v4 }
  0x96   :  { %952 = vmatprep.subr.bf16.mxu0 %v1177_v0 }
  0x99   :  { %953 = vmatpush3.bf16.msra.mxu0 %v1302_v5 }
  0x9a   :  { %954 = vmatprep.subr.bf16.mxu0 %v1177_v0 }
  0x9d   :  { %955 = vmatpush3.bf16.msra.mxu0 %v1013_v9 }
  0x9e   :  { %956 = vmatprep.subr.bf16.mxu0 %v1177_v0 }
  0xa1   :  { %957 = vmatpush3.bf16.msra.mxu0 %v1014_v11 }
  0xa2   :  { %958 = vmatprep.subr.bf16.mxu0 %v1177_v0 }
  0xa5   :  { %959 = vmatpush3.bf16.msra.mxu0 %v1015_v13 }
  0xa6   :  { %960 = vmatprep.subr.bf16.mxu0 %v1177_v0 }
  0xa9   :  { %961 = vmatpush3.bf16.msra.mxu0 %v1016_v15 }
  0xaa   :  { %993 = vmatprep.subr.bf16.mxu0 %v1180_v28 }
  0xac   :  { %963 = vmatmul.mubr.bf16.vlgmr.msra.gmra.mrb[8].mxu0 %v399_v22 }
  0xad   :  { %990 = vmatprep.mubr.msk.f32.mxu0 %vm1178_vm0, %v1177_v0  ;;  %995 = vmatpush3.bf16.msra.mxu0 %v994_v27 }
  0xcd   :  { %v487_v31 = vpop.permute.xlu0 %486 }
  0xce   :  { %vm488_vm2 = vcmp.eq.s32.totalorder %v484_v30, %v487_v31 }
  0xcf   :  { %v807_v32 = vsel %vm488_vm2, 1.0, %v1177_v0 }
  0xd0   :  { %991 = vmatmul.mubr.msk.f32.vlgmr.msra.gmra.mrb[12].mxu0 %vm493_vm1, %v807_v32 }
 0x13f   :  { %v212_v34 = vpop.f32.mrb[0].mxu0 }
 0x140   :  { %v213_v35 = vadd.f32 %v789_v33, %v212_v34  ;;  %v884_v36 = vpop.f32.mrb[1].mxu0 }
 0x141   :  { %v215_v37 = vpop.f32.mrb[2].mxu0 }
 0x142   :  { %v218_v38 = vmax.f32 %v213_v35, 0.0  ;;  %v885_v39 = vpop.f32.mrb[3].mxu0 }
 0x144   :  { %v219_v40 = vpack.c.bf16 %v218_v38, %v218_v38 }
 0x146   :  { %903 = vmatmul.mubr.bf16.vlgmr.msra.gmra.mrb[0].mxu1 %v219_v40 }
 0x147   :  { %927 = vmatpush3.bf16.msra.mxu1 %v1308_v7  ;;  %942 = vmatprep.mubr.msk.bf16.mxu1 %vm1178_vm0, %v1177_v0 }
 0x148   :  { %928 = vmatprep.subr.bf16.mxu1 %v1177_v0 }
 0x14b   :  { %929 = vmatpush3.bf16.msra.mxu1 %v1312_v8 }
 0x14c   :  { %930 = vmatprep.subr.bf16.mxu1 %v1177_v0 }
 0x14f   :  { %931 = vmatpush3.bf16.msra.mxu1 %v1317_v10 }
 0x150   :  { %932 = vmatprep.subr.bf16.mxu1 %v1177_v0 }
 0x153   :  { %933 = vmatpush3.bf16.msra.mxu1 %v1323_v12 }
 0x154   :  { %934 = vmatprep.subr.bf16.mxu1 %v1177_v0 }
 0x157   :  { %935 = vmatpush3.bf16.msra.mxu1 %v1328_v14 }
 0x158   :  { %936 = vmatprep.subr.bf16.mxu1 %v1177_v0 }
 0x15b   :  { %937 = vmatpush3.bf16.msra.mxu1 %v1336_v17 }
 0x15c   :  { %938 = vmatprep.subr.bf16.mxu1 %v1177_v0 }
 0x15f   :  { %v350_v41 = vpop.f32.mrb[4].mxu0  ;;  %939 = vmatpush3.bf16.msra.mxu1 %v1371_v23 }
 0x160   :  { %v351_v42 = vadd.f32 %v789_v33, %v350_v41  ;;  %v924_v43 = vpop.f32.mrb[5].mxu0  ;;  %940 = vmatprep.subr.bf16.mxu1 %v1177_v0 }
 0x161   :  { %v353_v44 = vpop.f32.mrb[6].mxu0 }
 0x162   :  { %v356_v45 = vmax.f32 %v351_v42, 0.0  ;;  %v925_v46 = vpop.f32.mrb[7].mxu0 }
 0x163   :  { %941 = vmatpush3.bf16.msra.mxu1 %v1375_v24 }
 0x164   :  { %v357_v47 = vpack.c.bf16 %v356_v45, %v356_v45  ;;  %966 = vmatprep.subr.bf16.mxu1 %v1177_v0 }
 0x166   :  { %943 = vmatmul.mubr.bf16.vlgmr.msra.gmra.mrb[4].mxu1 %v357_v47 }
 0x167   :  { %967 = vmatpush3.bf16.msra.mxu1 %v1308_v7  ;;  %982 = vmatprep.mubr.msk.bf16.mxu1 %vm1178_vm0, %v1177_v0 }
 0x168   :  { %968 = vmatprep.subr.bf16.mxu1 %v1177_v0 }
 0x16b   :  { %969 = vmatpush3.bf16.msra.mxu1 %v1312_v8 }
 0x16c   :  { %970 = vmatprep.subr.bf16.mxu1 %v1177_v0 }
 0x16f   :  { %971 = vmatpush3.bf16.msra.mxu1 %v1317_v10 }
 0x170   :  { %972 = vmatprep.subr.bf16.mxu1 %v1177_v0 }
 0x173   :  { %973 = vmatpush3.bf16.msra.mxu1 %v1323_v12 }
 0x174   :  { %974 = vmatprep.subr.bf16.mxu1 %v1177_v0 }
 0x177   :  { %975 = vmatpush3.bf16.msra.mxu1 %v1328_v14 }
 0x178   :  { %976 = vmatprep.subr.bf16.mxu1 %v1177_v0 }
 0x17b   :  { %977 = vmatpush3.bf16.msra.mxu1 %v1336_v17 }
 0x17c   :  { %978 = vmatprep.subr.bf16.mxu1 %v1177_v0 }
 0x17f   :  { %v434_v48 = vpop.f32.mrb[8].mxu0  ;;  %979 = vmatpush3.bf16.msra.mxu1 %v1371_v23 }
 0x180   :  { %v435_v49 = vadd.f32 %v789_v33, %v434_v48  ;;  %v964_v50 = vpop.f32.mrb[9].mxu0  ;;  %980 = vmatprep.subr.bf16.mxu1 %v1177_v0 }
 0x181   :  { %v437_v51 = vpop.f32.mrb[10].mxu0 }
 0x182   :  { %v440_v52 = vmax.f32 %v435_v49, 0.0  ;;  %v965_v53 = vpop.f32.mrb[11].mxu0 }
 0x183   :  { %981 = vmatpush3.bf16.msra.mxu1 %v1375_v24 }
 0x184   :  { %v441_v54 = vpack.c.bf16 %v440_v52, %v440_v52 }
 0x186   :  { %983 = vmatmul.mubr.bf16.vlgmr.msra.gmra.mrb[8].mxu1 %v441_v54 }
 0x1a3   :  { %v563_v55 = vpop.f32.mrb[12].mxu0 }
 0x1a4   :  { %v992_v56 = vpop.f32.mrb[13].mxu0 }
 0x219   :  { %v308_v58 = vpop.f32.mrb[0].mxu1 }
 0x21a   :  { %v309_v59 = vadd.f32 %v798_v57, %v308_v58  ;;  %v904_v60 = vpop.f32.mrb[1].mxu1 }
 0x21b   :  { %v311_v61 = vpop.f32.mrb[2].mxu1 }
 0x21c   :  { %v905_v62 = vpop.f32.mrb[3].mxu1  ;;  %v567_v63 = vadd.f32 %v563_v55, %v309_v59 }
 0x239   :  { %v392_v0 = vpop.f32.mrb[4].mxu1 }
 0x23a   :  { %v393_v1 = vadd.f32 %v798_v57, %v392_v0  ;;  %v944_v2 = vpop.f32.mrb[5].mxu1 }
 0x23b   :  { %v395_v3 = vpop.f32.mrb[6].mxu1 }
 0x23c   :  { %v568_v4 = vsub.f32 %v567_v63, %v393_v1  ;;  %v945_v5 = vpop.f32.mrb[7].mxu1 }
 0x23e   :  { %570 = vxpose.xlu0.b32.start.end [1/1] (short) %v568_v4, 128 }
 0x259   :  { %v476_v6 = vpop.f32.mrb[8].mxu1 }
 0x25a   :  { %v477_v7 = vadd.f32 %v798_v57, %v476_v6  ;;  %v984_v8 = vpop.f32.mrb[9].mxu1 }
 0x25b   :  { %v479_v9 = vpop.f32.mrb[10].mxu1 }
 0x25c   :  { %v985_v10 = vpop.f32.mrb[11].mxu1  ;;  %v569_v11 = vsub.f32 %v567_v63, %v477_v7 }
 0x25e   :  { %665 = vxpose.xlu1.b32.start.end [1/1] (short) %v569_v11, 128 }
 0x2be   :  { %v586_v12 = vpop.trf.xlu0 }
 0x2bf   :  { %v602_v13 = vmul.f32 %v586_v12, %v586_v12 }
 0x2c1   :  { %v619_v15 = vsel %vm618_vm3, %v602_v13, 0.0 }
 0x2c2   :  { %v587_v14 = vpop.trf.xlu0 }
 0x2c3   :  { %v603_v16 = vmul.f32 %v587_v14, %v587_v14 }
 0x2c5   :  { %v620_v17 = vsel %vm618_vm3, %v603_v16, 0.0 }
 0x2c6   :  { %v621_v18 = vadd.f32 %v620_v17, %v619_v15  ;;  %v588_v19 = vpop.trf.xlu0 }
 0x2c7   :  { %v604_v20 = vmul.f32 %v588_v19, %v588_v19 }
 0x2c9   :  { %v622_v21 = vsel %vm618_vm3, %v604_v20, 0.0 }
 0x2ca   :  { %v623_v22 = vadd.f32 %v622_v21, %v621_v18  ;;  %v589_v23 = vpop.trf.xlu0 }
 0x2cb   :  { %v605_v24 = vmul.f32 %v589_v23, %v589_v23 }
 0x2cd   :  { %v624_v25 = vsel %vm618_vm3, %v605_v24, 0.0 }
 0x2ce   :  { %v625_v26 = vadd.f32 %v624_v25, %v623_v22  ;;  %v590_v27 = vpop.trf.xlu0 }
 0x2cf   :  { %v606_v28 = vmul.f32 %v590_v27, %v590_v27 }
 0x2d1   :  { %v626_v29 = vsel %vm618_vm3, %v606_v28, 0.0 }
 0x2d2   :  { %v627_v30 = vadd.f32 %v626_v29, %v625_v26  ;;  %v591_v31 = vpop.trf.xlu0 }
 0x2d3   :  { %v607_v32 = vmul.f32 %v591_v31, %v591_v31 }
 0x2d5   :  { %v628_v33 = vsel %vm618_vm3, %v607_v32, 0.0 }
 0x2d6   :  { %v629_v34 = vadd.f32 %v628_v33, %v627_v30  ;;  %v592_v35 = vpop.trf.xlu0 }
 0x2d7   :  { %v608_v36 = vmul.f32 %v592_v35, %v592_v35 }
 0x2d9   :  { %v630_v37 = vsel %vm618_vm3, %v608_v36, 0.0 }
 0x2da   :  { %v631_v38 = vadd.f32 %v630_v37, %v629_v34  ;;  %v593_v39 = vpop.trf.xlu0 }
 0x2db   :  { %v609_v40 = vmul.f32 %v593_v39, %v593_v39 }
 0x2dd   :  { %v632_v41 = vsel %vm618_vm3, %v609_v40, 0.0 }
 0x2de   :  { %v633_v42 = vadd.f32 %v632_v41, %v631_v38  ;;  %v681_v43 = vpop.trf.xlu1  ;;  %v594_v44 = vpop.trf.xlu0 }
 0x2df   :  { %v610_v45 = vmul.f32 %v594_v44, %v594_v44  ;;  %v697_v18 = vmul.f32 %v681_v43, %v681_v43 }
 0x2e1   :  { %v634_v46 = vsel %vm618_vm3, %v610_v45, 0.0  ;;  %v713_v26 = vsel %vm618_vm3, %v697_v18, 0.0 }
 0x2e2   :  { %v635_v47 = vadd.f32 %v634_v46, %v633_v42  ;;  %v682_v48 = vpop.trf.xlu1  ;;  %v595_v49 = vpop.trf.xlu0 }
 0x2e3   :  { %v611_v50 = vmul.f32 %v595_v49, %v595_v49  ;;  %v698_v16 = vmul.f32 %v682_v48, %v682_v48 }
 0x2e5   :  { %v636_v51 = vsel %vm618_vm3, %v611_v50, 0.0  ;;  %v714_v23 = vsel %vm618_vm3, %v698_v16, 0.0 }
 0x2e6   :  { %v637_v52 = vadd.f32 %v636_v51, %v635_v47  ;;  %v683_v53 = vpop.trf.xlu1  ;;  %v596_v54 = vpop.trf.xlu0  ;;  %v715_v29 = vadd.f32 %v714_v23, %v713_v26 }
 0x2e7   :  { %v612_v55 = vmul.f32 %v596_v54, %v596_v54  ;;  %v699_v19 = vmul.f32 %v683_v53, %v683_v53 }
 0x2e9   :  { %v638_v56 = vsel %vm618_vm3, %v612_v55, 0.0  ;;  %v716_v27 = vsel %vm618_vm3, %v699_v19, 0.0 }
 0x2ea   :  { %v639_v57 = vadd.f32 %v638_v56, %v637_v52  ;;  %v684_v58 = vpop.trf.xlu1  ;;  %v597_v59 = vpop.trf.xlu0  ;;  %v717_v34 = vadd.f32 %v716_v27, %v715_v29 }
 0x2eb   :  { %v613_v60 = vmul.f32 %v597_v59, %v597_v59  ;;  %v700_v24 = vmul.f32 %v684_v58, %v684_v58 }
 0x2ed   :  { %v640_v61 = vsel %vm618_vm3, %v613_v60, 0.0  ;;  %v718_v32 = vsel %vm618_vm3, %v700_v24, 0.0 }
 0x2ee   :  { %v641_v62 = vadd.f32 %v640_v61, %v639_v57  ;;  %v685_v63 = vpop.trf.xlu1  ;;  %v598_v0 = vpop.trf.xlu0  ;;  %v719_v38 = vadd.f32 %v718_v32, %v717_v34 }
 0x2ef   :  { %v614_v1 = vmul.f32 %v598_v0, %v598_v0  ;;  %v701_v28 = vmul.f32 %v685_v63, %v685_v63 }
 0x2f1   :  { %v642_v2 = vsel %vm618_vm3, %v614_v1, 0.0  ;;  %v720_v36 = vsel %vm618_vm3, %v701_v28, 0.0 }
 0x2f2   :  { %v643_v3 = vadd.f32 %v642_v2, %v641_v62  ;;  %v686_v4 = vpop.trf.xlu1  ;;  %v599_v5 = vpop.trf.xlu0  ;;  %v721_v43 = vadd.f32 %v720_v36, %v719_v38 }
 0x2f3   :  { %v615_v6 = vmul.f32 %v599_v5, %v599_v5  ;;  %v702_v33 = vmul.f32 %v686_v4, %v686_v4 }
 0x2f5   :  { %v644_v7 = vsel %vm618_vm3, %v615_v6, 0.0  ;;  %v722_v41 = vsel %vm618_vm3, %v702_v33, 0.0 }
 0x2f6   :  { %v645_v8 = vadd.f32 %v644_v7, %v643_v3  ;;  %v687_v9 = vpop.trf.xlu1  ;;  %v600_v10 = vpop.trf.xlu0  ;;  %v723_v47 = vadd.f32 %v722_v41, %v721_v43 }
 0x2f7   :  { %v616_v11 = vmul.f32 %v600_v10, %v600_v10  ;;  %v703_v37 = vmul.f32 %v687_v9, %v687_v9 }
 0x2f9   :  { %v646_v12 = vsel %vm618_vm3, %v616_v11, 0.0  ;;  %v724_v45 = vsel %vm618_vm3, %v703_v37, 0.0 }
 0x2fa   :  { %v647_v13 = vadd.f32 %v646_v12, %v645_v8  ;;  %v688_v14 = vpop.trf.xlu1  ;;  %v601_v15 = vpop.trf.xlu0  ;;  %v725_v52 = vadd.f32 %v724_v45, %v723_v47 }
 0x2fb   :  { %v617_v17 = vmul.f32 %v601_v15, %v601_v15  ;;  %v704_v42 = vmul.f32 %v688_v14, %v688_v14 }
 0x2fd   :  { %v648_v20 = vsel %vm618_vm3, %v617_v17, 0.0  ;;  %v726_v50 = vsel %vm618_vm3, %v704_v42, 0.0 }
 0x2fe   :  { %v649_v21 = vadd.f32 %v648_v20, %v647_v13  ;;  %v689_v22 = vpop.trf.xlu1  ;;  %v727_v55 = vadd.f32 %v726_v50, %v725_v52 }
 0x2ff   :  { %v705_v46 = vmul.f32 %v689_v22, %v689_v22 }
 0x300   :  { %v650_v25 = vrot.slane %v649_v21, 4 }
 0x301   :  { %v728_v53 = vsel %vm618_vm3, %v705_v46, 0.0 }
 0x302   :  { %v651_v30 = vadd.f32 %v650_v25, %v649_v21  ;;  %v690_v31 = vpop.trf.xlu1  ;;  %v729_v59 = vadd.f32 %v728_v53, %v727_v55 }
 0x303   :  { %v706_v51 = vmul.f32 %v690_v31, %v690_v31 }
 0x304   :  { %v652_v35 = vrot.slane %v651_v30, 2 }
 0x305   :  { %v730_v57 = vsel %vm618_vm3, %v706_v51, 0.0 }
 0x306   :  { %v653_v39 = vadd.f32 %v652_v35, %v651_v30  ;;  %v691_v40 = vpop.trf.xlu1  ;;  %v731_v62 = vadd.f32 %v730_v57, %v729_v59 }
 0x307   :  { %v707_v54 = vmul.f32 %v691_v40, %v691_v40 }
 0x308   :  { %v654_v44 = vrot.slane %v653_v39, 1 }
 0x309   :  { %v732_v60 = vsel %vm618_vm3, %v707_v54, 0.0 }
 0x30a   :  { %v655_v48 = vadd.f32 %v654_v44, %v653_v39  ;;  %v692_v49 = vpop.trf.xlu1  ;;  %v733_v2 = vadd.f32 %v732_v60, %v731_v62 }
 0x30b   :  { %v708_v58 = vmul.f32 %v692_v49, %v692_v49 }
 0x30c   :  { %1025 = vrsqrt.f32 %v655_v48  ;;  %vm658_vm4 = vcmp.eq.f32.partialorder %v655_v48, inf  ;;  %v661_v11 = vand.u32 2147483648, %v655_v48  ;;  %vm660_vm6 = vcmp.eq.f32.partialorder %v655_v48, 0.0 }
 0x30d   :  { %v734_v0 = vsel %vm618_vm3, %v708_v58, 0.0 }
 0x30e   :  { %v693_v56 = vpop.trf.xlu1  ;;  %v735_v5 = vadd.f32 %v734_v0, %v733_v2 }
 0x30f   :  { %v709_v61 = vmul.f32 %v693_v56, %v693_v56 }
 0x311   :  { %v736_v3 = vsel %vm618_vm3, %v709_v61, 0.0 }
 0x312   :  { %v694_v63 = vpop.trf.xlu1  ;;  %v737_v10 = vadd.f32 %v736_v3, %v735_v5 }
 0x313   :  { %v710_v1 = vmul.f32 %v694_v63, %v694_v63 }
 0x315   :  { %v738_v7 = vsel %vm618_vm3, %v710_v1, 0.0 }
 0x316   :  { %v1026_v4 = vpop.eup %1025  ;;  %v695_v6 = vpop.trf.xlu1  ;;  %v739_v14 = vadd.f32 %v738_v7, %v737_v10 }
 0x317   :  { %v711_v8 = vmul.f32 %v695_v6, %v695_v6  ;;  %v657_v9 = vmul.f32 %v1026_v4, %v655_v48 }
 0x319   :  { %v740_v12 = vsel %vm618_vm3, %v711_v8, 0.0  ;;  %v659_v13 = vsel %vm658_vm4, %v655_v48, %v657_v9 }
 0x31a   :  { %v696_v15 = vpop.trf.xlu1  ;;  %v662_v16 = vsel %vm660_vm6, %v661_v11, %v659_v13  ;;  %v741_v18 = vadd.f32 %v740_v12, %v739_v14 }
 0x31b   :  { %v712_v17 = vmul.f32 %v696_v15, %v696_v15  ;;  %664 = vst.msk [vmem:[#allocation10] sm:$0x1] %vm663_vm5, %v662_v16 }
 0x31c   :  { %1128 = shalt.err (!%p1125_p8)
}
 0x31d   :  { %s1129_s30 = scalar_lea.hbm %s1494_s9, 16 }
 0x31e   :  { %p1130_p9 = scmp.ne.s32.totalorder %s1494_s9, %s1129_s30  ;;  %p1133_p10 = scmp.lt.u32.totalorder %s1129_s30, %s1494_s9 }
 0x320   :  { %p1135_p11 = pnand %p1133_p10, %p1130_p9 }
 0x322   :  { %1138 = shalt.err (!%p1135_p11)
}
 0x323   :  { %767 = dma.vmem_to_hbm [thread:$0]  %s765_s2, 16, %s1494_s9, [#allocation4]   ;;  %v742_v19 = vsel %vm618_vm3, %v712_v17, 0.0 }
 0x324   :  { %v743_v20 = vadd.f32 %v742_v19, %v741_v18  ;;  %s1182_s17 = smov [#allocation11]  }
 0x325   :  { %s774_s19 = sshll.u32 %s1182_s17, 4  ;;  %s775_s19 = int_to_ptr.vmem [resolvable:$true] %s774_s19 }
 0x326   :  { %v744_v21 = vrot.slane %v743_v20, 4  ;;  %s1139_s9 = scalar_lea.vmem %s775_s19, 16  ;;  %s1143_s5 = scalar_lea.vmem %s775_s19, 32 }
 0x327   :  { %p1140_p12 = scmp.ne.s32.totalorder %s775_s19, %s1139_s9  ;;  %p1144_p13 = scmp.lt.s32.totalorder %s775_s19, %s775_s19 }
 0x328   :  { %v745_v22 = vadd.f32 %v744_v21, %v743_v20  ;;  %p1145_p0 = scmp.lt.s32.totalorder %s1143_s5, %s1139_s9 }
 0x32a   :  { %v746_v23 = vrot.slane %v745_v22, 2  ;;  %p1146_p1 = por %p1145_p0, %p1144_p13 }
 0x32c   :  { %v747_v24 = vadd.f32 %v746_v23, %v745_v22  ;;  %p1147_p2 = pnand %p1146_p1, %p1140_p12 }
 0x32e   :  { %v748_v25 = vrot.slane %v747_v24, 1 }
 0x330   :  { %v749_v26 = vadd.f32 %v748_v25, %v747_v24 }
 0x332   :  { %1027 = vrsqrt.f32 %v749_v26  ;;  %vm752_vm7 = vcmp.eq.f32.partialorder %v749_v26, inf  ;;  %v755_v29 = vand.u32 2147483648, %v749_v26  ;;  %vm754_vm8 = vcmp.eq.f32.partialorder %v749_v26, 0.0 }
 0x33c   :  { %v1028_v27 = vpop.eup %1027 }
 0x33d   :  { %v751_v28 = vmul.f32 %v1028_v27, %v749_v26 }
 0x33f   :  { %v753_v30 = vsel %vm752_vm7, %v749_v26, %v751_v28 }
 0x340   :  { %v756_v31 = vsel %vm754_vm8, %v755_v29, %v753_v30 }
 0x341   :  { %757 = vst.msk [vmem:[#allocation11] sm:$0x1] %vm663_vm5, %v756_v31 }
 0x342   :  { %1150 = shalt.err (!%p1147_p2)
}
 0x343   :  { %s1151_s20 = scalar_lea.hbm %s1495_s10, 16 }
 0x344   :  { %p1152_p3 = scmp.ne.s32.totalorder %s1495_s10, %s1151_s20  ;;  %p1155_p4 = scmp.lt.u32.totalorder %s1151_s20, %s1495_s10 }
 0x346   :  { %p1157_p5 = pnand %p1155_p4, %p1152_p3 }
 0x348   :  { %1160 = shalt.err (!%p1157_p5)
}
 0x349   :  { %777 = dma.vmem_to_hbm [thread:$0]  %s775_s19, 16, %s1495_s10, [#allocation12]  }
 0x34a   :  { %1167 = dma.done.wait [#allocation4], 16  }
 0x34b   :  { %1168 = vsyncadd [#allocation4], 4294967280 }
 0x34c   :  { %1169 = dma.done.wait [#allocation12], 16  }
 0x34d   :  { %1170 = vsyncadd [#allocation12], 4294967280 }
 0x34e   :  { %784 = vsyncpa [#allocation3], 1 }
 0x34f   :  { %785 = vsyncpa [#allocation6], 1 }
 0x350   :  { %786 = vsyncpa [#allocation9], 1 }
 0x351   :  { %787 = vsyncpa [#allocation4], 1 }
 0x352   :  { %788 = vsyncpa [#allocation12], 1 }

</bundles_post_ra>
